<compile_context>
chip_gen: v7x
topology: tpu7x:2x2x1
jax: 0.10.0
libtpu: 0.0.40
codegen_flags: <defaults>
</compile_context>

<pallas_src>
import jax
import jax.numpy as jnp
from jax.experimental import pallas as pl
from jax.experimental.pallas import tpu as pltpu

IN_F, HID, OUT_F = 4, 16, 3
LANE = 128


def iris_mlp_kernel(x_ref, w1_ref, b1_ref, w2t_ref, b2_ref, o_ref):
    """One lane-dense batch tile: h = relu(W1 @ x + b1); y = W2 @ h + b2.

    x_ref: (4, TB), w1_ref: (16, 4), b1_ref: (16, 1),
    w2t_ref: (16, 3)  [W2 pre-transposed], b2_ref: (3, 1), o_ref: (3, TB).
    Batch rides the 128-lane axis; feature dims are unrolled on the VPU/XLU.
    """
    x = x_ref[...]                # (4,  TB) f32
    w1 = w1_ref[...]              # (16, 4)   PyTorch layout (out, in)
    w2t = w2t_ref[...]            # (16, 3)   = W2.T

    # Layer 1: h[j, b] = sum_k w1[j, k] * x[k, b]   (K = 4, fully unrolled).
    # Initialize with the k=0 term -- no full-tile zeros add.
    h = w1[:, 0:1] * x[0:1, :]                     # (16,1)*(1,TB) -> (16,TB)
    for k in range(1, IN_F):
        h = h + w1[:, k:k + 1] * x[k:k + 1, :]
    h = jnp.maximum(h + b1_ref[...], 0.0)          # bias (16,1) bcast over lanes

    # Layer 2: y[j, b] = sum_k w2[j, k] * h[k, b].
    # Sublane-dense multiply on the full (16,TB) hidden tile, then a sublane-
    # axis reduction (XLU) per output row -- no (3,TB) partial-vreg FMAs, no
    # per-k sublane broadcasts.
    rows = [jnp.sum(w2t[:, j:j + 1] * h, axis=0, keepdims=True)   # (1, TB)
            for j in range(OUT_F)]
    y = jnp.concatenate(rows, axis=0) + b2_ref[...]               # (3, TB)

    o_ref[...] = y.astype(o_ref.dtype)


def _choose_batch_tile(B, max_tile):
    """Pick a lane-dense batch tile bounding tail waste and keeping >=2 grid
    steps (for v7x's 2 TensorCores) when the batch is big enough."""
    n_tiles = pl.cdiv(B, max_tile)
    if n_tiles == 1 and B > 2 * LANE:
        n_tiles = 2
    tb = max(LANE, pl.cdiv(pl.cdiv(B, n_tiles), LANE) * LANE)
    return tb


def reference_forward(x, w1, b1, w2, b2):
    """Pure-JAX reference with PyTorch nn.Linear semantics (x @ W.T + b)."""
    h = jnp.maximum(x @ w1.T + b1, 0.0)
    return h @ w2.T + b2


def iris_net_forward(x, w1, b1, w2, b2, *, batch_tile=4096,
                     small_batch_threshold=1024, force_pallas=False):
    """Pallas forward pass matching IrisNet.

    x: (B, 4) f32. Weights in PyTorch layout: w1 (16, 4), b1 (16,),
    w2 (3, 16), b2 (3,). Returns (B, 3) f32.
    """
    B = x.shape[0]

    # Small-batch fast path: at Iris-scale B the wall clock is entirely
    # pallas_call launch overhead + wrapper transposes; fused XLA wins.
    if not force_pallas and B < small_batch_threshold:
        return reference_forward(x, w1, b1, w2, b2)

    tb = _choose_batch_tile(B, batch_tile)
    bp = pl.cdiv(B, tb) * tb
    grid = (bp // tb,)

    xt = jnp.transpose(x)                        # (4, B): layout flip outside kernel
    if bp != B:
        xt = jnp.pad(xt, ((0, 0), (0, bp - B)))
    b1c = b1.reshape(HID, 1)
    w2t = jnp.transpose(w2)                      # (16, 3): column slices are (HID,1)
    b2c = b2.reshape(OUT_F, 1)

    flops = 2 * bp * (IN_F * HID + HID * OUT_F)
    bytes_accessed = 4 * (IN_F * bp + OUT_F * bp
                          + HID * IN_F + HID + HID * OUT_F + OUT_F)

    out_t = pl.pallas_call(
        iris_mlp_kernel,
        out_shape=jax.ShapeDtypeStruct((OUT_F, bp), jnp.float32),
        grid=grid,
        in_specs=[
            pl.BlockSpec((IN_F, tb), lambda i: (0, i)),      # x: lane-dense batch tile
            pl.BlockSpec((HID, IN_F), lambda i: (0, 0)),     # w1: resident across grid
            pl.BlockSpec((HID, 1), lambda i: (0, 0)),        # b1
            pl.BlockSpec((HID, OUT_F), lambda i: (0, 0)),    # w2^T
            pl.BlockSpec((OUT_F, 1), lambda i: (0, 0)),      # b2
        ],
        out_specs=pl.BlockSpec((OUT_F, tb), lambda i: (0, i)),
        compiler_params=pltpu.CompilerParams(
            dimension_semantics=("parallel",)),              # shard batch across TCs (v7x)
        cost_estimate=pl.CostEstimate(
            flops=flops, transcendentals=0, bytes_accessed=bytes_accessed),
    )(xt, w1, b1c, w2t, b2c)

    # Slice to B columns BEFORE the transpose so padded tail is never copied.
    return jnp.transpose(out_t[:, :B])


def init_params(key):
    """Deterministic init matching nn.Linear(4,16), nn.Linear(16,3) (PyTorch layout)."""
    k1, k2, k3, k4 = jax.random.split(key, 4)
    bound1 = 1.0 / jnp.sqrt(4.0)
    bound2 = 1.0 / jnp.sqrt(16.0)
    w1 = jax.random.uniform(k1, (HID, IN_F), jnp.float32, -bound1, bound1)
    b1 = jax.random.uniform(k2, (HID,), jnp.float32, -bound1, bound1)
    w2 = jax.random.uniform(k3, (OUT_F, HID), jnp.float32, -bound2, bound2)
    b2 = jax.random.uniform(k4, (OUT_F,), jnp.float32, -bound2, bound2)
    return w1, b1, w2, b2


if __name__ == "__main__":
    key = jax.random.PRNGKey(0)
    kx, kp, kx2 = jax.random.split(key, 3)
    w1, b1, w2, b2 = init_params(kp)

    # Small Iris-like batch (B, 4); force the Pallas path to exercise the kernel.
    B = 8
    x = jax.random.normal(kx, (B, IN_F), dtype=jnp.float32)
    out = jax.block_until_ready(
        iris_net_forward(x, w1, b1, w2, b2, force_pallas=True))
    ref = reference_forward(x, w1, b1, w2, b2)
    assert out.shape == (B, OUT_F)
    assert jnp.allclose(out, ref, atol=1e-5, rtol=1e-5), "mismatch vs reference (B=8)"

    # Multi-step grid (>=2 steps for v7x megacore) + padded-tail path: B=260
    # -> tb=256, bp=512, grid=(2,).
    B2 = 260
    x2 = jax.random.normal(kx2, (B2, IN_F), dtype=jnp.float32)
    out2 = jax.block_until_ready(
        iris_net_forward(x2, w1, b1, w2, b2, force_pallas=True))
    ref2 = reference_forward(x2, w1, b1, w2, b2)
    assert out2.shape == (B2, OUT_F)
    assert jnp.allclose(out2, ref2, atol=1e-5, rtol=1e-5), "mismatch vs reference (B=260)"

    # Small-batch fast path (pure XLA) when not forced.
    out3 = jax.block_until_ready(iris_net_forward(x, w1, b1, w2, b2))
    assert jnp.allclose(out3, ref, atol=1e-5, rtol=1e-5), "fast-path mismatch"

    print("KERNEL_OK")
</pallas_src>

<mosaic_0001>
module attributes {stable_mosaic.version = 11 : i64} {
  func.func @iris_mlp_kernel(%arg0: i32, %arg1: memref<4x128xf32, #tpu.memory_space<vmem>>, %arg2: memref<16x4xf32, #tpu.memory_space<vmem>>, %arg3: memref<16x1xf32, #tpu.memory_space<vmem>>, %arg4: memref<16x3xf32, #tpu.memory_space<vmem>>, %arg5: memref<3x1xf32, #tpu.memory_space<vmem>>, %arg6: memref<3x128xf32, #tpu.memory_space<vmem>>) attributes {dimension_semantics = [#tpu.dimension_semantics<parallel>], iteration_bounds = array<i64: 1>, scalar_prefetch = 0 : i64, scratch_operands = 0 : i64, tpu.core_type = #tpu.core_type<tc>, window_params = [{transform_indices = @transform_0, window_bounds = array<i64: 4, 128>}, {pipeline_mode = #tpu.pipeline_mode<synchronous>, transform_indices = @transform_1, window_bounds = array<i64: 16, 4>}, {pipeline_mode = #tpu.pipeline_mode<synchronous>, transform_indices = @transform_2, window_bounds = array<i64: 16, 1>}, {pipeline_mode = #tpu.pipeline_mode<synchronous>, transform_indices = @transform_3, window_bounds = array<i64: 16, 3>}, {pipeline_mode = #tpu.pipeline_mode<synchronous>, transform_indices = @transform_4, window_bounds = array<i64: 3, 1>}, {transform_indices = @transform_5, window_bounds = array<i64: 3, 128>}]} {
    %c0 = arith.constant 0 : index
    %c0_0 = arith.constant 0 : index
    %0 = vector.load %arg1[%c0, %c0_0] : memref<4x128xf32, #tpu.memory_space<vmem>>, vector<4x128xf32>
    %c0_1 = arith.constant 0 : index
    %c0_2 = arith.constant 0 : index
    %1 = vector.load %arg2[%c0_1, %c0_2] : memref<16x4xf32, #tpu.memory_space<vmem>>, vector<16x4xf32>
    %c0_3 = arith.constant 0 : index
    %c0_4 = arith.constant 0 : index
    %2 = vector.load %arg4[%c0_3, %c0_4] : memref<16x3xf32, #tpu.memory_space<vmem>>, vector<16x3xf32>
    %3 = vector.extract_strided_slice %1 {offsets = [0, 0], sizes = [16, 1], strides = [1, 1]} : vector<16x4xf32> to vector<16x1xf32>
    %4 = vector.extract_strided_slice %0 {offsets = [0, 0], sizes = [1, 128], strides = [1, 1]} : vector<4x128xf32> to vector<1x128xf32>
    %5 = vector.broadcast %3 : vector<16x1xf32> to vector<16x128xf32>
    %6 = vector.broadcast %4 : vector<1x128xf32> to vector<16x128xf32>
    %7 = arith.mulf %5, %6 : vector<16x128xf32>
    %8 = vector.extract_strided_slice %1 {offsets = [0, 1], sizes = [16, 1], strides = [1, 1]} : vector<16x4xf32> to vector<16x1xf32>
    %9 = vector.extract_strided_slice %0 {offsets = [1, 0], sizes = [1, 128], strides = [1, 1]} : vector<4x128xf32> to vector<1x128xf32>
    %10 = vector.broadcast %8 : vector<16x1xf32> to vector<16x128xf32>
    %11 = vector.broadcast %9 : vector<1x128xf32> to vector<16x128xf32>
    %12 = arith.mulf %10, %11 : vector<16x128xf32>
    %13 = arith.addf %7, %12 : vector<16x128xf32>
    %14 = vector.extract_strided_slice %1 {offsets = [0, 2], sizes = [16, 1], strides = [1, 1]} : vector<16x4xf32> to vector<16x1xf32>
    %15 = vector.extract_strided_slice %0 {offsets = [2, 0], sizes = [1, 128], strides = [1, 1]} : vector<4x128xf32> to vector<1x128xf32>
    %16 = vector.broadcast %14 : vector<16x1xf32> to vector<16x128xf32>
    %17 = vector.broadcast %15 : vector<1x128xf32> to vector<16x128xf32>
    %18 = arith.mulf %16, %17 : vector<16x128xf32>
    %19 = arith.addf %13, %18 : vector<16x128xf32>
    %20 = vector.extract_strided_slice %1 {offsets = [0, 3], sizes = [16, 1], strides = [1, 1]} : vector<16x4xf32> to vector<16x1xf32>
    %21 = vector.extract_strided_slice %0 {offsets = [3, 0], sizes = [1, 128], strides = [1, 1]} : vector<4x128xf32> to vector<1x128xf32>
    %22 = vector.broadcast %20 : vector<16x1xf32> to vector<16x128xf32>
    %23 = vector.broadcast %21 : vector<1x128xf32> to vector<16x128xf32>
    %24 = arith.mulf %22, %23 : vector<16x128xf32>
    %25 = arith.addf %19, %24 : vector<16x128xf32>
    %c0_5 = arith.constant 0 : index
    %c0_6 = arith.constant 0 : index
    %26 = vector.load %arg3[%c0_5, %c0_6] : memref<16x1xf32, #tpu.memory_space<vmem>>, vector<16x1xf32>
    %27 = vector.broadcast %26 : vector<16x1xf32> to vector<16x128xf32>
    %28 = arith.addf %25, %27 : vector<16x128xf32>
    %cst = arith.constant 0.000000e+00 : f32
    %29 = vector.broadcast %cst : f32 to vector<16x128xf32>
    %30 = arith.maximumf %28, %29 : vector<16x128xf32>
    %31 = vector.extract_strided_slice %2 {offsets = [0, 0], sizes = [16, 1], strides = [1, 1]} : vector<16x3xf32> to vector<16x1xf32>
    %32 = vector.broadcast %31 : vector<16x1xf32> to vector<16x128xf32>
    %33 = arith.mulf %32, %30 : vector<16x128xf32>
    %cst_7 = arith.constant dense<0.000000e+00> : vector<128xf32>
    %34 = vector.multi_reduction <add>, %33, %cst_7 [0] : vector<16x128xf32> to vector<128xf32>
    %35 = vector.shape_cast %34 : vector<128xf32> to vector<1x128xf32>
    %36 = vector.extract_strided_slice %2 {offsets = [0, 1], sizes = [16, 1], strides = [1, 1]} : vector<16x3xf32> to vector<16x1xf32>
    %37 = vector.broadcast %36 : vector<16x1xf32> to vector<16x128xf32>
    %38 = arith.mulf %37, %30 : vector<16x128xf32>
    %cst_8 = arith.constant dense<0.000000e+00> : vector<128xf32>
    %39 = vector.multi_reduction <add>, %38, %cst_8 [0] : vector<16x128xf32> to vector<128xf32>
    %40 = vector.shape_cast %39 : vector<128xf32> to vector<1x128xf32>
    %41 = vector.extract_strided_slice %2 {offsets = [0, 2], sizes = [16, 1], strides = [1, 1]} : vector<16x3xf32> to vector<16x1xf32>
    %42 = vector.broadcast %41 : vector<16x1xf32> to vector<16x128xf32>
    %43 = arith.mulf %42, %30 : vector<16x128xf32>
    %cst_9 = arith.constant dense<0.000000e+00> : vector<128xf32>
    %44 = vector.multi_reduction <add>, %43, %cst_9 [0] : vector<16x128xf32> to vector<128xf32>
    %45 = vector.shape_cast %44 : vector<128xf32> to vector<1x128xf32>
    %46 = tpu.concatenate %35, %40, %45 in 0 : vector<1x128xf32>, vector<1x128xf32>, vector<1x128xf32> -> vector<3x128xf32>
    %c0_10 = arith.constant 0 : index
    %c0_11 = arith.constant 0 : index
    %47 = vector.load %arg5[%c0_10, %c0_11] : memref<3x1xf32, #tpu.memory_space<vmem>>, vector<3x1xf32>
    %48 = vector.broadcast %47 : vector<3x1xf32> to vector<3x128xf32>
    %49 = arith.addf %46, %48 : vector<3x128xf32>
    %c0_12 = arith.constant 0 : index
    %c0_13 = arith.constant 0 : index
    %50 = vector.load %arg6[%c0_12, %c0_13] : memref<3x128xf32, #tpu.memory_space<vmem>>, vector<3x128xf32>
    tpu.vector_store %arg6[%c0_12, %c0_13], %49 {strides = array<i32>} : memref<3x128xf32, #tpu.memory_space<vmem>>, vector<3x128xf32>,
    return
  }
  func.func @transform_0(%arg0: i32) -> (i32, i32) {
    %c0_i32 = arith.constant 0 : i32
    %c0_i32_0 = arith.constant 0 : i32
    return %c0_i32, %arg0 : i32, i32
  }
  func.func @transform_1(%arg0: i32) -> (i32, i32) {
    %c0_i32 = arith.constant 0 : i32
    %c0_i32_0 = arith.constant 0 : i32
    %c0_i32_1 = arith.constant 0 : i32
    return %c0_i32, %c0_i32_0 : i32, i32
  }
  func.func @transform_2(%arg0: i32) -> (i32, i32) {
    %c0_i32 = arith.constant 0 : i32
    %c0_i32_0 = arith.constant 0 : i32
    %c0_i32_1 = arith.constant 0 : i32
    return %c0_i32, %c0_i32_0 : i32, i32
  }
  func.func @transform_3(%arg0: i32) -> (i32, i32) {
    %c0_i32 = arith.constant 0 : i32
    %c0_i32_0 = arith.constant 0 : i32
    %c0_i32_1 = arith.constant 0 : i32
    return %c0_i32, %c0_i32_0 : i32, i32
  }
  func.func @transform_4(%arg0: i32) -> (i32, i32) {
    %c0_i32 = arith.constant 0 : i32
    %c0_i32_0 = arith.constant 0 : i32
    %c0_i32_1 = arith.constant 0 : i32
    return %c0_i32, %c0_i32_0 : i32, i32
  }
  func.func @transform_5(%arg0: i32) -> (i32, i32) {
    %c0_i32 = arith.constant 0 : i32
    %c0_i32_0 = arith.constant 0 : i32
    return %c0_i32, %arg0 : i32, i32
  }
}

</mosaic_0001>

<bundles_post_ra>
// kernel: tpu_custom_call.1
= control target key start
LH: loop header
LB: loop body
LE: loop exit
PB: predicated region body
PF: predicated region fallthrough
CT: control target
= control target key end

     0   :  { %v225_v1 = vmov 2   ;;  %v226_v2 = vmov 1   ;;  %s296_s0 = inlined_call_operand.vmem [shape: f32[4,128], index: 0, kind: input, shape index: {}]   ;;  %s297_s1 = inlined_call_operand.vmem [shape: f32[16,4], index: 1, kind: input, shape index: {}]   ;;  %s298_s2 = inlined_call_operand.vmem [shape: f32[16,1], index: 2, kind: input, shape index: {}]   ;;  %s299_s3 = inlined_call_operand.vmem [shape: f32[16,3], index: 3, kind: input, shape index: {}]   ;;  %s300_s4 = inlined_call_operand.vmem [shape: f32[3,1], index: 4, kind: input, shape index: {}]   ;;  %s301_s5 = inlined_call_operand.hbm [shape: f32[3,128], index: 5, kind: output, shape index: {}]  }
   0x1   :  { %v22_v0 = vld [vmem:[%s297_s1] sm:$0xff]  ;;  %191 = vset.pattern.permute.xlu0 %v225_v1  ;;  %190 = vset.pattern.permute.xlu1 %v226_v2  ;;  %v23_v3 = vld [vmem:[%s297_s1 + $0x8] sm:$0xff] }
   0x2   :  { %59 = vperm.xlu0 %191, %v22_v0   ;;  %43 = vperm.xlu1 %190, %v22_v0  }
   0x3   :  { %10 = vsyncpa [#allocation3], 0  ;;  %v227_v4 = vmov 3   ;;  %v228_v5 = vmov 0   ;;  %v24_v6 = vld [vmem:[%s299_s3] sm:$0xff]  ;;  %v91_v8 = vld [vmem:[%s298_s2 + $0x8] sm:$0xff]  ;;  %v36_v11 = vlaneseq }
   0x4   :  { %v90_v7 = vld [vmem:[%s298_s2] sm:$0xff]  ;;  %v25_v9 = vld [vmem:[%s299_s3 + $0x8] sm:$0xff]  ;;  %vm159_vm0 = vcmask 1040384   ;;  %vm161_vm1 = vcmask 1041408  }
   0x5   :  { %v163_v10 = vld [vmem:[%s300_s4] sm:$0x7]  ;;  %v37_v12 = vshrl.u32 %v36_v11, 7 }
   0x6   :  { %194 = vset.pattern.permute.xlu0 %v227_v4  ;;  %47 = vperm.xlu1 %190, %v23_v3   ;;  %v21_v17 = vld [vmem:[%s296_s0] sm:$0xf]  ;;  %s229_s0 = smov [#allocation2]  }
   0x7   :  { %79 = vperm.xlu0 %194, %v23_v3   ;;  %v52_v15 = vsub.s32 1, %v37_v12  ;;  %v38_v16 = vsub.s32 0, %v37_v12  ;;  %v68_v19 = vsub.s32 2, %v37_v12  ;;  %v84_v22 = vsub.s32 3, %v37_v12  ;;  %s177_s4 = sshll.u32 %s229_s0, 4  ;;  %s178_s4 = int_to_ptr.vmem [resolvable:$true] %s177_s4 }
   0x8   :  { %s201_s6 = scalar_lea.vmem %s178_s4, 64  ;;  %p206_p1 = scmp.lt.s32.totalorder %s178_s4, %s178_s4 }
   0x9   :  { %v53_v21 = vrot.slane %v21_v17, %v52_v15  ;;  %v39_v23 = vrot.slane %v21_v17, %v38_v16  ;;  %v69_v24 = vrot.slane %v21_v17, %v68_v19  ;;  %v85_v29 = vrot.slane %v21_v17, %v84_v22  ;;  %p202_p0 = scmp.ne.s32.totalorder %s178_s4, %s201_s6  ;;  %p207_p2 = scmp.lt.s32.totalorder %s201_s6, %s201_s6 }
   0xa   :  { %192 = vset.pattern.permute.xlu1 %v225_v1 }
   0xb   :  { %195 = vset.pattern.permute.xlu0 %v228_v5  ;;  %63 = vperm.xlu1 %192, %v23_v3   ;;  %p208_p3 = por %p207_p2, %p206_p1 }
   0xc   :  { %28 = vperm.xlu0 %195, %v22_v0  }
   0xd   :  { %p209_p4 = pnand %p208_p3, %p202_p0 }
   0xf   :  { %193 = vset.pattern.permute.xlu1 %v227_v4 }
  0x10   :  { %33 = vperm.xlu0 %195, %v23_v3   ;;  %75 = vperm.xlu1 %193, %v22_v0  }
  0x14   :  { %196 = vset.pattern.permute.xlu1 %v228_v5  ;;  %108 = vperm.xlu0 %195, %v24_v6  }
  0x15   :  { %94 = vperm.xlu1 %196, %v90_v7  }
  0x18   :  { %198 = vset.pattern.permute.xlu0 %v226_v2 }
  0x19   :  { %99 = vperm.xlu1 %196, %v91_v8   ;;  %130 = vperm.xlu0 %198, %v25_v9  }
  0x1d   :  { %113 = vperm.xlu1 %196, %v25_v9   ;;  %200 = vset.pattern.permute.xlu0 %v228_v5 }
  0x1e   :  { %166 = vperm.xlu0 %200, %v163_v10  }
  0x21   :  { %197 = vset.pattern.permute.xlu1 %v226_v2 }
  0x22   :  { %126 = vperm.xlu1 %197, %v24_v6  }
  0x26   :  { %199 = vset.pattern.permute.xlu1 %v225_v1 }
  0x27   :  { %143 = vperm.xlu1 %199, %v24_v6  }
  0x2b   :  { %147 = vperm.xlu1 %199, %v25_v9  }
  0x81   :  { %v44_v13 = vpop.permute.xlu1 %43  ;;  %v60_v14 = vpop.permute.xlu0 %59 }
  0x82   :  { %v54_v27 = vmul.f32 %v53_v21, %v44_v13  ;;  %v70_v28 = vmul.f32 %v69_v24, %v60_v14 }
  0x85   :  { %v48_v18 = vpop.permute.xlu1 %47 }
  0x86   :  { %v80_v20 = vpop.permute.xlu0 %79  ;;  %v55_v34 = vmul.f32 %v53_v21, %v48_v18 }
  0x87   :  { %v87_v38 = vmul.f32 %v85_v29, %v80_v20 }
  0x8a   :  { %v64_v25 = vpop.permute.xlu1 %63 }
  0x8b   :  { %v29_v26 = vpop.permute.xlu0 %28  ;;  %v71_v39 = vmul.f32 %v69_v24, %v64_v25 }
  0x8c   :  { %v40_v30 = vmul.f32 %v39_v23, %v29_v26 }
  0x8e   :  { %v56_v31 = vadd.f32 %v54_v27, %v40_v30 }
  0x8f   :  { %v34_v32 = vpop.permute.xlu0 %33  ;;  %v76_v33 = vpop.permute.xlu1 %75 }
  0x90   :  { %v41_v35 = vmul.f32 %v39_v23, %v34_v32  ;;  %v86_v36 = vmul.f32 %v85_v29, %v76_v33  ;;  %v72_v37 = vadd.f32 %v70_v28, %v56_v31 }
  0x92   :  { %v57_v40 = vadd.f32 %v55_v34, %v41_v35  ;;  %v88_v41 = vadd.f32 %v86_v36, %v72_v37 }
  0x93   :  { %v109_v47 = vpop.permute.xlu0 %108 }
  0x94   :  { %v95_v42 = vpop.permute.xlu1 %94  ;;  %v73_v43 = vadd.f32 %v71_v39, %v57_v40 }
  0x95   :  { %v102_v44 = vadd.f32 %v95_v42, %v88_v41 }
  0x96   :  { %v89_v45 = vadd.f32 %v87_v38, %v73_v43 }
  0x97   :  { %v104_v49 = vmax.f32 %v102_v44, 0.0 }
  0x98   :  { %v100_v46 = vpop.permute.xlu1 %99  ;;  %v131_v54 = vpop.permute.xlu0 %130 }
  0x99   :  { %v103_v48 = vadd.f32 %v100_v46, %v89_v45  ;;  %v116_v53 = vmul.f32 %v109_v47, %v104_v49 }
  0x9b   :  { %v105_v50 = vmax.f32 %v103_v48, 0.0 }
  0x9c   :  { %v114_v51 = vpop.permute.xlu1 %113 }
  0x9d   :  { %v117_v52 = vmul.f32 %v114_v51, %v105_v50  ;;  %v134_v57 = vmul.f32 %v131_v54, %v105_v50  ;;  %v167_v18 = vpop.permute.xlu0 %166 }
  0x9f   :  { %v118_v55 = vadd.f32 %v117_v52, %v116_v53 }
  0xa1   :  { %v127_v56 = vpop.permute.xlu1 %126  ;;  %v119_v59 = vrot.slane %v118_v55, 4 }
  0xa2   :  { %v133_v58 = vmul.f32 %v127_v56, %v104_v49 }
  0xa3   :  { %v120_v63 = vadd.f32 %v119_v59, %v118_v55 }
  0xa4   :  { %v135_v60 = vadd.f32 %v134_v57, %v133_v58 }
  0xa5   :  { %v121_v5 = vrot.slane %v120_v63, 2 }
  0xa6   :  { %v136_v61 = vrot.slane %v135_v60, 4  ;;  %v144_v62 = vpop.permute.xlu1 %143 }
  0xa7   :  { %v150_v3 = vmul.f32 %v144_v62, %v104_v49  ;;  %v122_v9 = vadd.f32 %v121_v5, %v120_v63 }
  0xa8   :  { %v137_v0 = vadd.f32 %v136_v61, %v135_v60 }
  0xa9   :  { %v123_v13 = vrot.slane %v122_v9, 1 }
  0xaa   :  { %v138_v1 = vrot.slane %v137_v0, 2  ;;  %v148_v2 = vpop.permute.xlu1 %147 }
  0xab   :  { %v151_v4 = vmul.f32 %v148_v2, %v105_v50  ;;  %v124_v17 = vadd.f32 %v123_v13, %v122_v9 }
  0xac   :  { %v139_v7 = vadd.f32 %v138_v1, %v137_v0 }
  0xad   :  { %v152_v6 = vadd.f32 %v151_v4, %v150_v3 }
  0xae   :  { %v140_v11 = vrot.slane %v139_v7, 1 }
  0xaf   :  { %v153_v8 = vrot.slane %v152_v6, 4 }
  0xb0   :  { %v141_v15 = vadd.f32 %v140_v11, %v139_v7 }
  0xb1   :  { %v154_v10 = vadd.f32 %v153_v8, %v152_v6 }
  0xb2   :  { %v160_v20 = vsel %vm159_vm0, %v124_v17, %v141_v15 }
  0xb3   :  { %v155_v12 = vrot.slane %v154_v10, 2 }
  0xb5   :  { %v156_v14 = vadd.f32 %v155_v12, %v154_v10 }
  0xb7   :  { %v157_v16 = vrot.slane %v156_v14, 1 }
  0xb9   :  { %v158_v19 = vadd.f32 %v157_v16, %v156_v14 }
  0xbb   :  { %v162_v21 = vsel %vm161_vm1, %v160_v20, %v158_v19 }
  0xbc   :  { %v169_v22 = vadd.f32 %v167_v18, %v162_v21 }
  0xbe   :  { %170 = vst [vmem:[#allocation2] sm:$0x7] %v169_v22 }
  0xbf   :  { %212 = shalt.err (!%p209_p4)
}
  0xc0   :  { %s213_s9 = scalar_lea.hbm %s301_s5, 64 }
  0xc1   :  { %p214_p5 = scmp.ne.s32.totalorder %s301_s5, %s213_s9  ;;  %p217_p6 = scmp.lt.u32.totalorder %s213_s9, %s301_s5 }
  0xc3   :  { %p219_p7 = pnand %p217_p6, %p214_p5 }
  0xc5   :  { %222 = shalt.err (!%p219_p7)
}
  0xc6   :  { %180 = dma.vmem_to_hbm [thread:$0]  %s178_s4, 64, %s301_s5, [#allocation3]  }
  0xc7   :  { %223 = dma.done.wait [#allocation3], 64  }
  0xc8   :  { %224 = vsyncadd [#allocation3], 4294967232 }
  0xc9   :  { %184 = vsyncpa [#allocation3], 1 }

</bundles_post_ra>
